<compile_context>
chip_gen: v6e
topology: v6e:2x2x1
jax: 0.10.0
libtpu: 0.0.40
codegen_flags: <defaults>
</compile_context>

<pallas_src>
import jax
import jax.numpy as jnp
from jax.experimental import pallas as pl
from jax.experimental.pallas import tpu as pltpu


def mlp_kernel(x_ref, w1_ref, b1_ref, w2_ref, b2_ref, o_ref):
    # Fused: matmul1 (MXU, f32 accum) -> bias+ReLU (VPU, f32) -> matmul2 -> bias.
    w1 = w1_ref[...]                                        # (D_in, H)  compute dtype
    w2 = w2_ref[...]                                        # (H, D_out) compute dtype
    x = x_ref[...].astype(w1.dtype)                         # in-kernel cast, no HBM copy

    h = jnp.dot(x, w1, preferred_element_type=jnp.float32)  # (TB, H) f32
    h = h + b1_ref[...]                                     # f32 bias add
    h = jnp.maximum(h, 0.0)                                 # f32 ReLU (v5e-safe)
    h = h.astype(w2.dtype)                                  # back to compute dtype for MXU

    y = jnp.dot(h, w2, preferred_element_type=jnp.float32)  # (TB, D_out) f32
    y = y + b2_ref[...]                                      # f32 bias add
    o_ref[...] = y.astype(o_ref.dtype)


def _round_up(n, m):
    return ((n + m - 1) // m) * m


def _cdiv(a, b):
    return (a + b - 1) // b


# Conservative per-step working-set budget -- fits v5e (16 MiB scoped default,
# raised via vmem_limit_bytes), v6e (32 MiB scoped) and v7x (32 MiB scoped /
# 64 MiB physical) with headroom for compiler-internal scratch.
_VMEM_BUDGET = 20 << 20


def _tile_vmem_bytes(tb, d_in, h, d_out, x_bytes, cd_bytes, out_bytes):
    x_buf = 2 * tb * d_in * x_bytes                      # double-buffered input tile
    o_buf = 2 * tb * d_out * out_bytes                   # double-buffered output tile
    w_buf = 2 * (d_in * h + h * d_out) * cd_bytes        # resident weights (x2, conservative)
    b_buf = 2 * (h + d_out) * 4                          # f32 bias rows
    inter = tb * h * 4 + tb * max(d_in, h) * cd_bytes    # f32 intermediate + cast temp
    return x_buf + o_buf + w_buf + b_buf + inter


def prepare_params(w1, b1, w2, b2, *, compute_dtype=jnp.float32):
    """One-time (per-model) parameter prep -- hoisted out of the forward path.

    w1: (D_in, H), w2: (H, D_out) -- PyTorch nn.Linear weights pre-transposed.
    Weights are cast to compute_dtype (f32 = exact parity; bf16 = MXU throughput
    mode on v6e/v7x, intentionally non-exact).  Biases stay f32 as (1, N) rows.
    """
    w1p = jnp.asarray(w1, compute_dtype)
    w2p = jnp.asarray(w2, compute_dtype)
    b1p = jnp.asarray(b1, jnp.float32).reshape(1, -1)
    b2p = jnp.asarray(b2, jnp.float32).reshape(1, -1)
    return w1p, b1p, w2p, b2p


def linear_regression_forward(x, w1, b1, w2, b2, *, batch_tile=4096):
    """x: (B, D_in); (w1, b1, w2, b2) from prepare_params(). Returns (B, D_out)."""
    B, D_in = x.shape
    D_in_w, H = w1.shape
    H2, D_out = w2.shape
    assert D_in == D_in_w and H == H2, "parameter shapes do not match input"

    cd = w1.dtype
    # bf16 packs 2 rows per sublane -> 16-row batch alignment; f32 -> 8.
    align = 16 if jnp.dtype(cd).itemsize < 4 else 8
    x_bytes = jnp.dtype(x.dtype).itemsize
    cd_bytes = jnp.dtype(cd).itemsize
    out_bytes = x_bytes

    # Largest batch tile within the VMEM budget (and <= batch_tile, <= ~B).
    tb = max(align, _round_up(min(batch_tile, B), align))
    while tb > align and _tile_vmem_bytes(
            tb, D_in, H, D_out, x_bytes, cd_bytes, out_bytes) > _VMEM_BUDGET:
        tb -= align
    # Minimize last-tile overshoot and keep >= 2 grid steps for batches big
    # enough to split (so the "parallel" axis can use both v7x TensorCores).
    num_tiles = _cdiv(B, tb)
    if B >= 2 * align:
        num_tiles = max(num_tiles, 2)
    tb = min(tb, _round_up(_cdiv(B, num_tiles), align))
    grid = (_cdiv(B, tb),)

    need = _tile_vmem_bytes(tb, D_in, H, D_out, x_bytes, cd_bytes, out_bytes)
    vmem_limit = int(min(max(need + (8 << 20), 32 << 20), 48 << 20))

    cost = pl.CostEstimate(
        flops=2 * B * (D_in * H + H * D_out),
        transcendentals=0,
        bytes_accessed=(x.size * x_bytes + w1.size * cd_bytes + w2.size * cd_bytes
                        + b1.size * 4 + b2.size * 4 + B * D_out * out_bytes),
    )

    # TODO(synk): for H / D_in large enough that w1/w2 cannot stay VMEM-resident
    # (H ~ 4k-8k in f32 on v7x), add a K-axis "arbitrary" grid dim with an f32
    # accumulator scratch (pl.when init/finalize) instead of fully resident weights.
    return pl.pallas_call(
        mlp_kernel,
        out_shape=jax.ShapeDtypeStruct((B, D_out), x.dtype),
        grid=grid,
        in_specs=[
            # Batch tile marches with the grid; feature dims use full-array
            # blocks (no HBM padding -- Mosaic zero-fills remainders in-register).
            pl.BlockSpec((tb, D_in), lambda i: (i, 0)),
            # Weights / biases: constant block index -> DMA'd once, stay resident.
            pl.BlockSpec((D_in, H), lambda i: (0, 0)),
            pl.BlockSpec((1, H), lambda i: (0, 0)),
            pl.BlockSpec((H, D_out), lambda i: (0, 0)),
            pl.BlockSpec((1, D_out), lambda i: (0, 0)),
        ],
        out_specs=pl.BlockSpec((tb, D_out), lambda i: (i, 0)),
        compiler_params=pltpu.CompilerParams(
            dimension_semantics=("parallel",),
            vmem_limit_bytes=vmem_limit,
        ),
        cost_estimate=cost,
    )(x, w1, b1, w2, b2)


if __name__ == "__main__":
    # Small shapes consistent with the module: batch=64, input=32, hidden=64, output=16.
    B, D_in, H, D_out = 64, 32, 64, 16

    key = jax.random.PRNGKey(0)
    kx, kw1, kb1, kw2, kb2 = jax.random.split(key, 5)

    x = jax.random.normal(kx, (B, D_in), dtype=jnp.float32)
    # PyTorch nn.Linear weights, pre-transposed to (in, out).
    w1 = jax.random.normal(kw1, (D_in, H), dtype=jnp.float32) * 0.1
    b1 = jax.random.normal(kb1, (H,), dtype=jnp.float32) * 0.1
    w2 = jax.random.normal(kw2, (H, D_out), dtype=jnp.float32) * 0.1
    b2 = jax.random.normal(kb2, (D_out,), dtype=jnp.float32) * 0.1

    ref = jnp.maximum(x @ w1 + b1, 0.0) @ w2 + b2

    fwd = jax.jit(linear_regression_forward)

    # Exact-semantics f32 path (matches the PyTorch module bit-for-bit semantics).
    p_f32 = prepare_params(w1, b1, w2, b2, compute_dtype=jnp.float32)
    out_f32 = jax.block_until_ready(fwd(x, *p_f32))
    assert out_f32.shape == (B, D_out)
    assert jnp.allclose(out_f32, ref, atol=1e-5, rtol=1e-5)

    # bf16-MXU throughput variant (recommended on v6e/v7x); intentionally non-exact.
    p_bf16 = prepare_params(w1, b1, w2, b2, compute_dtype=jnp.bfloat16)
    out_bf16 = jax.block_until_ready(fwd(x, *p_bf16))
    assert out_bf16.shape == (B, D_out)
    assert jnp.allclose(out_bf16, ref, atol=3e-2, rtol=3e-2)

    print("KERNEL_OK")
</pallas_src>

<mosaic_0001>
module attributes {stable_mosaic.version = 11 : i64} {
  func.func @mlp_kernel(%arg0: i32, %arg1: memref<32x32xf32, #tpu.memory_space<vmem>>, %arg2: memref<32x64xf32, #tpu.memory_space<vmem>>, %arg3: memref<1x64xf32, #tpu.memory_space<vmem>>, %arg4: memref<64x16xf32, #tpu.memory_space<vmem>>, %arg5: memref<1x16xf32, #tpu.memory_space<vmem>>, %arg6: memref<32x16xf32, #tpu.memory_space<vmem>>) attributes {dimension_semantics = [#tpu.dimension_semantics<parallel>], iteration_bounds = array<i64: 2>, scalar_prefetch = 0 : i64, scratch_operands = 0 : i64, tpu.core_type = #tpu.core_type<tc>, window_params = [{transform_indices = @transform_0, window_bounds = array<i64: 32, 32>}, {pipeline_mode = #tpu.pipeline_mode<synchronous>, transform_indices = @transform_1, window_bounds = array<i64: 32, 64>}, {pipeline_mode = #tpu.pipeline_mode<synchronous>, transform_indices = @transform_2, window_bounds = array<i64: 1, 64>}, {pipeline_mode = #tpu.pipeline_mode<synchronous>, transform_indices = @transform_3, window_bounds = array<i64: 64, 16>}, {pipeline_mode = #tpu.pipeline_mode<synchronous>, transform_indices = @transform_4, window_bounds = array<i64: 1, 16>}, {transform_indices = @transform_5, window_bounds = array<i64: 32, 16>}]} {
    %c0 = arith.constant 0 : index
    %c0_0 = arith.constant 0 : index
    %0 = vector.load %arg2[%c0, %c0_0] : memref<32x64xf32, #tpu.memory_space<vmem>>, vector<32x64xf32>
    %c0_1 = arith.constant 0 : index
    %c0_2 = arith.constant 0 : index
    %1 = vector.load %arg4[%c0_1, %c0_2] : memref<64x16xf32, #tpu.memory_space<vmem>>, vector<64x16xf32>
    %c0_3 = arith.constant 0 : index
    %c0_4 = arith.constant 0 : index
    %2 = vector.load %arg1[%c0_3, %c0_4] : memref<32x32xf32, #tpu.memory_space<vmem>>, vector<32x32xf32>
    %cst = arith.constant dense<0.000000e+00> : vector<32x64xf32>
    %3 = tpu.matmul %2, %0, %cst {dimension_numbers = #tpu.dot_dimension_numbers<[1], [0], [0], [1], [0, 0, 1, 1], [], []>} : vector<32x32xf32>, vector<32x64xf32>, vector<32x64xf32> -> vector<32x64xf32>
    %c0_5 = arith.constant 0 : index
    %c0_6 = arith.constant 0 : index
    %4 = vector.load %arg3[%c0_5, %c0_6] : memref<1x64xf32, #tpu.memory_space<vmem>>, vector<1x64xf32>
    %5 = vector.broadcast %4 : vector<1x64xf32> to vector<32x64xf32>
    %6 = arith.addf %3, %5 : vector<32x64xf32>
    %cst_7 = arith.constant 0.000000e+00 : f32
    %7 = vector.broadcast %cst_7 : f32 to vector<32x64xf32>
    %8 = arith.maximumf %6, %7 : vector<32x64xf32>
    %cst_8 = arith.constant dense<0.000000e+00> : vector<32x16xf32>
    %9 = tpu.matmul %8, %1, %cst_8 {dimension_numbers = #tpu.dot_dimension_numbers<[1], [0], [0], [1], [0, 0, 1, 1], [], []>} : vector<32x64xf32>, vector<64x16xf32>, vector<32x16xf32> -> vector<32x16xf32>
    %c0_9 = arith.constant 0 : index
    %c0_10 = arith.constant 0 : index
    %10 = vector.load %arg5[%c0_9, %c0_10] : memref<1x16xf32, #tpu.memory_space<vmem>>, vector<1x16xf32>
    %11 = vector.broadcast %10 : vector<1x16xf32> to vector<32x16xf32>
    %12 = arith.addf %9, %11 : vector<32x16xf32>
    %c0_11 = arith.constant 0 : index
    %c0_12 = arith.constant 0 : index
    %13 = vector.load %arg6[%c0_11, %c0_12] : memref<32x16xf32, #tpu.memory_space<vmem>>, vector<32x16xf32>
    tpu.vector_store %arg6[%c0_11, %c0_12], %12 {strides = array<i32>} : memref<32x16xf32, #tpu.memory_space<vmem>>, vector<32x16xf32>,
    return
  }
  func.func @transform_0(%arg0: i32) -> (i32, i32) {
    %c0_i32 = arith.constant 0 : i32
    %c0_i32_0 = arith.constant 0 : i32
    return %arg0, %c0_i32 : i32, i32
  }
  func.func @transform_1(%arg0: i32) -> (i32, i32) {
    %c0_i32 = arith.constant 0 : i32
    %c0_i32_0 = arith.constant 0 : i32
    %c0_i32_1 = arith.constant 0 : i32
    return %c0_i32, %c0_i32_0 : i32, i32
  }
  func.func @transform_2(%arg0: i32) -> (i32, i32) {
    %c0_i32 = arith.constant 0 : i32
    %c0_i32_0 = arith.constant 0 : i32
    %c0_i32_1 = arith.constant 0 : i32
    return %c0_i32, %c0_i32_0 : i32, i32
  }
  func.func @transform_3(%arg0: i32) -> (i32, i32) {
    %c0_i32 = arith.constant 0 : i32
    %c0_i32_0 = arith.constant 0 : i32
    %c0_i32_1 = arith.constant 0 : i32
    return %c0_i32, %c0_i32_0 : i32, i32
  }
  func.func @transform_4(%arg0: i32) -> (i32, i32) {
    %c0_i32 = arith.constant 0 : i32
    %c0_i32_0 = arith.constant 0 : i32
    %c0_i32_1 = arith.constant 0 : i32
    return %c0_i32, %c0_i32_0 : i32, i32
  }
  func.func @transform_5(%arg0: i32) -> (i32, i32) {
    %c0_i32 = arith.constant 0 : i32
    %c0_i32_0 = arith.constant 0 : i32
    return %arg0, %c0_i32 : i32, i32
  }
}

</mosaic_0001>

<bundles_post_ra>
// kernel: linear_regression_forward.1
= control target key start
LH: loop header
LB: loop body
LE: loop exit
PB: predicated region body
PF: predicated region fallthrough
CT: control target
= control target key end

     0   :  { %s642_s18 = smov 0   ;;  %s712_s0 = inlined_call_operand.vmem [shape: f32[64,32], index: 0, kind: input, shape index: {}]   ;;  %s713_s1 = inlined_call_operand.vmem [shape: f32[32,64], index: 1, kind: input, shape index: {}]   ;;  %s714_s2 = inlined_call_operand.vmem [shape: f32[1,64], index: 2, kind: input, shape index: {}]   ;;  %s715_s3 = inlined_call_operand.vmem [shape: f32[64,16], index: 3, kind: input, shape index: {}]   ;;  %s716_s4 = inlined_call_operand.vmem [shape: f32[1,16], index: 4, kind: input, shape index: {}]   ;;  %s717_s5 = inlined_call_operand.vmem [shape: f32[64,16], index: 5, kind: output, shape index: {}]  }
   0x1 LB: > { %s519_s19 = sadd.s32 4294967295, %s610_s18   ;;  %p523_p0 = scmp.ge.s32.totalorder %s610_s18, 1  ;;  %s610_s18 = sphi %s642_s18, %s15_s18  }
   0x2   : > { %p188_p1 = scmp.lt.s32.totalorder %s610_s18, 3 }
   0x4   : > { %p189_p2 = pnand %p523_p0, %p188_p1 }
   0x5   : > { %s524_s24 = sshll.u32 (!%p189_p2), %s519_s19, 2 }
   0x6   : > { %192 = sbr.rel (%p189_p2) target bundleno = 422 (0x1a6), region = 40  ;;  %p217_p3 = scmp.lt.s32.totalorder (!%p189_p2), %s524_s24, 7 }
   0xb   : > { %v231_v0 = vld [vmem:[%s713_s1 + $0x18] sm:$0xff]  ;;  %v230_v1 = vld [vmem:[%s713_s1 + $0x10] sm:$0xff]  ;;  %v229_v4 = vld [vmem:[%s713_s1 + $0x8] sm:$0xff]  ;;  %s719_s24 = smov (!%p217_p3, %s524_s24), 7  ;;  %vm251_vm0 = vcmask 261120   ;;  %vm360_vm1 = vcmask 523264  }
   0xc   : > { %560 = vmatprep.subr.mxu0 %v231_v0  ;;  %v239_v2 = vld [vmem:[%s715_s3 + $0x38] sm:$0xff]  ;;  %v238_v3 = vld [vmem:[%s715_s3 + $0x30] sm:$0xff]  ;;  %v237_v5 = vld [vmem:[%s715_s3 + $0x28] sm:$0xff]  ;;  %s525_s10 = sshll.u32 %s719_s24, 3  ;;  %vm458_vm2 = vcmask 130048  }
   0xd   : > { %561 = vmatpush3.msra.mxu0 %v231_v0  ;;  %574 = vmatprep.subr.mxu1 %v239_v2  ;;  %v228_v6 = vld [vmem:[%s713_s1] sm:$0xff]  ;;  %s220_s13 = scalar_lea.vmem %s712_s0, %s525_s10  ;;  %v235_v12 = vld [vmem:[%s715_s3 + $0x18] sm:$0xff]  ;;  %v234_v13 = vld [vmem:[%s715_s3 + $0x10] sm:$0xff]  ;;  %s226_s7 = scalar_lea.vmem %s717_s5, %s525_s10 }
   0xe   : > { %562 = vmatprep.subr.mxu0 %v230_v1  ;;  %575 = vmatpush3.msra.mxu1 %v239_v2  ;;  %v236_v7 = vld [vmem:[%s715_s3 + $0x20] sm:$0xff]  ;;  %v241_v9 = vld [vmem:[%s220_s13 + $0x8] sm:$0xff]  ;;  %v242_v10 = vld [vmem:[%s220_s13 + $0x10] sm:$0xff] }
   0xf   : > { %563 = vmatpush3.msra.mxu0 %v230_v1  ;;  %576 = vmatprep.subr.mxu1 %v238_v3  ;;  %v240_v8 = vld [vmem:[%s220_s13] sm:$0xff]  ;;  %v243_v11 = vld [vmem:[%s220_s13 + $0x18] sm:$0xff]  ;;  %v233_v14 = vld [vmem:[%s715_s3 + $0x8] sm:$0xff] }
  0x10   : > { %564 = vmatprep.subr.mxu0 %v229_v4  ;;  %577 = vmatpush3.msra.mxu1 %v238_v3  ;;  %v232_v15 = vld [vmem:[%s715_s3] sm:$0xff] }
  0x11   : > { %565 = vmatpush3.msra.mxu0 %v229_v4  ;;  %578 = vmatprep.subr.mxu1 %v237_v5  ;;  %v528_v16 = vld [vmem:[%s714_s2] ss:$0 sm:$0xff] }
  0x12   : > { %566 = vmatprep.subr.mxu0 %v228_v6  ;;  %579 = vmatpush3.msra.mxu1 %v237_v5  ;;  %v533_v30 = vld [vmem:[%s716_s4] ss:$0 sm:$0xff] }
  0x13   : > { %567 = vmatpush3.msra.mxu0 %v228_v6  ;;  %568 = vmatprep.mubr.msk.f32.mxu0 %vm251_vm0, %v240_v8 }
  0x14   : > { %569 = vmatmul.mubr.msk.f32.vlgmr.msra.gmra.mxu0 %vm251_vm0, %v241_v9  ;;  %580 = vmatprep.subr.mxu1 %v236_v7 }
  0x15   : > { %571 = vmatprep.mubr.msk.f32.mxu0 %vm251_vm0, %v242_v10  ;;  %581 = vmatpush3.msra.mxu1 %v236_v7 }
  0x16   : > { %582 = vmatprep.subr.mxu1 %v235_v12 }
  0x17   : > { %583 = vmatpush3.msra.mxu1 %v235_v12 }
  0x18   : > { %572 = vmatmul.mubr.msk.f32.gmra.mxu0 %vm251_vm0, %v243_v11  ;;  %584 = vmatprep.subr.mxu1 %v234_v13 }
  0x19   : > { %585 = vmatpush3.msra.mxu1 %v234_v13 }
  0x1a   : > { %586 = vmatprep.subr.mxu1 %v233_v14 }
  0x1b   : > { %587 = vmatpush3.msra.mxu1 %v233_v14 }
  0x1c   : > { %588 = vmatprep.subr.mxu1 %v232_v15 }
  0x1d   : > { %589 = vmatpush3.msra.mxu1 %v232_v15 }
  0xd4   : > { %v570_v17 = vpop.f32.mrf.mxu0 }
  0xd5   : > { %v336_v18 = vadd.f32 %v570_v17, %v528_v16 }
  0xd6   : > { %v330_v19 = vpop.f32.mrf.mxu0 }
  0xd7   : > { %v331_v20 = vadd.f32 %v528_v16, %v330_v19  ;;  %v350_v23 = vmax.f32 %v336_v18, 0.0 }
  0xd8   : > { %v573_v21 = vpop.f32.mrf.mxu0 }
  0xd9   : > { %v349_v22 = vmax.f32 %v331_v20, 0.0  ;;  %v346_v24 = vadd.f32 %v573_v21, %v528_v16 }
  0xda   : > { %v340_v25 = vpop.f32.mrf.mxu0 }
  0xdb   : > { %v341_v26 = vadd.f32 %v528_v16, %v340_v25  ;;  %590 = vmatprep.mubr.msk.f32.mxu1 %vm360_vm1, %v349_v22  ;;  %v352_v28 = vmax.f32 %v346_v24, 0.0 }
  0xdc   : > { %591 = vmatmul.mubr.msk.f32.vlgmr.msra.gmra.mxu1 %vm360_vm1, %v350_v23 }
  0xdd   : > { %v351_v27 = vmax.f32 %v341_v26, 0.0 }
  0xdf   : > { %593 = vmatprep.mubr.msk.f32.mxu1 %vm360_vm1, %v351_v27 }
  0xe0   : > { %594 = vmatmul.mubr.msk.f32.gmra.mxu1 %vm360_vm1, %v352_v28 }
 0x19c   : > { %v592_v29 = vpop.f32.mrf.mxu1 }
 0x19d   : > { %v445_v33 = vadd.f32 %v592_v29, %v533_v30 }
 0x19e   : > { %v439_v31 = vpop.f32.mrf.mxu1 }
 0x19f   : > { %v440_v32 = vadd.f32 %v533_v30, %v439_v31  ;;  %460 = vst.msk [vmem:[%s226_s7 + $0x8] sm:$0xff] %vm458_vm2, %v445_v33 }
 0x1a0   : > { %v595_v34 = vpop.f32.mrf.mxu1 }
 0x1a1   : > { %459 = vst.msk [vmem:[%s226_s7] sm:$0xff] %vm458_vm2, %v440_v32  ;;  %v455_v37 = vadd.f32 %v595_v34, %v533_v30 }
 0x1a2   : > { %v449_v35 = vpop.f32.mrf.mxu1 }
 0x1a3   : > { %v450_v36 = vadd.f32 %v533_v30, %v449_v35  ;;  %462 = vst.msk [vmem:[%s226_s7 + $0x18] sm:$0xff] %vm458_vm2, %v455_v37 }
 0x1a5   : > { %461 = vst.msk [vmem:[%s226_s7 + $0x10] sm:$0xff] %vm458_vm2, %v450_v36 }
 0x1a6 PF: > { %s15_s18 = sadd.s32 1, %s610_s18  }
 0x1a7   : > { %p12_p4 = scmp.ge.s32.totalorder %s15_s18, 4  }
 0x1a9   :  { %14 = sbr.rel (!%p12_p4) target bundleno = 1 (0x1), region = 70 }

</bundles_post_ra>
